<compile_context>
chip_gen: v7x
topology: tpu7x:2x2x1
jax: 0.10.0
libtpu: 0.0.40
codegen_flags: <defaults>
</compile_context>

<pallas_src>
import functools

import jax
import jax.numpy as jnp
from jax.experimental import pallas as pl
from jax.experimental.pallas import tpu as pltpu

EPS = 1e-5  # nn.BatchNorm2d default eps


# ----------------------------------- kernel ---------------------------------

def conv_bn_relu_kernel(t_ref, w_ref, g_ref, beta_ref, o_ref):
    """Fused (pre-im2col'd) 3x3 conv -> BatchNorm2d (batch stats) -> ReLU.

    t_ref   : (9*Cin, NHW)  lane-dense im2col taps, rows ordered (dy, dx, cin)
    w_ref   : (Cout, 9*Cin) conv weights, columns ordered (dy, dx, cin)
    g_ref   : (Cout, 1)     BN gamma
    beta_ref: (Cout, 1)     BN beta
    o_ref   : (Cout, NHW)   lane-dense transposed output (f32)
    """
    nhw = o_ref.shape[1]

    # Single MXU matmul with f32 accumulation; result is already lane-dense.
    acc = jnp.dot(w_ref[...], t_ref[...],
                  preferred_element_type=jnp.float32)        # (Cout, NHW) f32

    # NOTE: the conv bias is intentionally omitted — a per-channel constant
    # added before train-mode BatchNorm cancels exactly in the mean subtraction.

    # BatchNorm2d (training mode): per-channel batch stats over N*H*W (lane
    # axis -> XLU reductions), then a single fused per-channel affine + ReLU
    # pass over the slab (no explicit centering pass).
    inv_nhw = 1.0 / nhw
    s1 = jnp.sum(acc, axis=1, keepdims=True)                 # (Cout, 1)
    s2 = jnp.sum(acc * acc, axis=1, keepdims=True)           # (Cout, 1)
    mean = s1 * inv_nhw
    var = jnp.maximum(s2 * inv_nhw - mean * mean, 0.0)       # biased batch var
    inv = jax.lax.rsqrt(var + EPS)                           # EUP
    scale = inv * g_ref[...]                                 # (Cout, 1)
    shift = beta_ref[...] - mean * scale                     # (Cout, 1)
    o_ref[...] = jnp.maximum(acc * scale + shift, 0.0)


# ----------------------------------- wrapper --------------------------------

@functools.partial(jax.jit, static_argnames=("use_bf16",))
def conv_forward(x_nchw, params, use_bf16=True):
    """PyTorch-style forward: x (N, Cin, H, W) -> (N, Cout, H, W)."""
    w, _b, g, beta = params                     # w: (3, 3, Cin, Cout) HWIO
    N, Cin, H, W = x_nchw.shape
    Cout = w.shape[-1]
    NHW = N * H * W
    mxu_dtype = jnp.bfloat16 if use_bf16 else jnp.float32

    # im2col hoisted to the wrapper: lane-dense (9*Cin, NHW) tap matrix with
    # the big N*H*W axis minor; the bf16 cast for the MXU also happens here.
    # TODO(synk): in a fused multi-layer pipeline, consume/produce this
    # channel-major layout directly instead of round-tripping through NCHW.
    xpad = jnp.pad(x_nchw, ((0, 0), (0, 0), (1, 1), (1, 1)))  # (N,Cin,H+2,W+2)
    taps = [jnp.transpose(xpad[:, :, dy:dy + H, dx:dx + W], (1, 0, 2, 3))
            .reshape(Cin, NHW)
            for dy in range(3) for dx in range(3)]
    tap_mat = jnp.concatenate(taps, axis=0).astype(mxu_dtype)  # (9*Cin, NHW)

    # HWIO -> (Cout, 9*Cin); column order (dy, dx, cin) matches tap_mat rows.
    w2d = jnp.transpose(w, (3, 0, 1, 2)).reshape(Cout, 9 * Cin).astype(mxu_dtype)
    g2 = g.reshape(Cout, 1).astype(jnp.float32)
    be2 = beta.reshape(Cout, 1).astype(jnp.float32)

    inputs = (tap_mat, w2d, g2, be2)

    def fullspec(arr):
        zeros = (0,) * arr.ndim
        return pl.BlockSpec(arr.shape, lambda i, _z=zeros: _z)

    flops = 2 * NHW * (9 * Cin) * Cout + 6 * NHW * Cout       # conv + BN/ReLU
    bytes_accessed = (sum(int(a.size) * a.dtype.itemsize for a in inputs)
                      + NHW * Cout * 4)

    out_t = pl.pallas_call(
        conv_bn_relu_kernel,
        out_shape=jax.ShapeDtypeStruct((Cout, NHW), jnp.float32),
        grid=(1,),
        in_specs=[fullspec(a) for a in inputs],
        out_specs=pl.BlockSpec((Cout, NHW), lambda i: (0, 0)),
        compiler_params=pltpu.CompilerParams(
            dimension_semantics=("arbitrary",)),
        cost_estimate=pl.CostEstimate(
            flops=flops, transcendentals=Cout, bytes_accessed=bytes_accessed),
    )(*inputs)

    # (Cout, N*H*W) -> (N, Cout, H, W): wrapper-side layout plumbing back to
    # the PyTorch layout (kernel output itself is lane-dense).
    return jnp.transpose(out_t.reshape(Cout, N, H, W), (1, 0, 2, 3))


# ------------------------------ params & reference --------------------------

def init_params(key, in_channels, out_channels):
    ks = jax.random.split(key, 4)
    w = jax.random.normal(ks[0], (3, 3, in_channels, out_channels),
                          jnp.float32) / jnp.sqrt(9.0 * in_channels)
    b = 0.1 * jax.random.normal(ks[1], (out_channels,), jnp.float32)
    g = 1.0 + 0.1 * jax.random.normal(ks[2], (out_channels,), jnp.float32)
    beta = 0.1 * jax.random.normal(ks[3], (out_channels,), jnp.float32)
    return (w, b, g, beta)


def reference(x_nchw, params):
    """Pure-JAX (XLA) reference matching the PyTorch forward in train mode.

    Keeps the conv bias to demonstrate that omitting it in the kernel is
    exact (it cancels under train-mode BatchNorm).
    """
    w, b, g, beta = params
    dn = ("NHWC", "HWIO", "NHWC")
    x = jnp.transpose(x_nchw, (0, 2, 3, 1))
    x = jax.lax.conv_general_dilated(x, w, (1, 1), "SAME",
                                     dimension_numbers=dn) + b.reshape(1, 1, 1, -1)
    m = jnp.mean(x, axis=(0, 1, 2), keepdims=True)
    v = jnp.mean((x - m) ** 2, axis=(0, 1, 2), keepdims=True)
    y = (x - m) / jnp.sqrt(v + EPS) * g.reshape(1, 1, 1, -1) + beta.reshape(1, 1, 1, -1)
    y = jnp.maximum(y, 0.0)
    return jnp.transpose(y, (0, 3, 1, 2))


# ------------------------------------ main -----------------------------------

if __name__ == "__main__":
    key = jax.random.PRNGKey(0)
    kx, kp = jax.random.split(key)

    N, Cin, H, W = 2, 4, 16, 16          # Conv(in_channels=4, out_channels=8)
    Cout = 8

    x = jax.random.normal(kx, (N, Cin, H, W), jnp.float32)
    params = init_params(kp, Cin, Cout)

    ref = reference(x, params)

    # f32 MXU path: tight agreement with the XLA reference.
    out_f32 = conv_forward(x, params, use_bf16=False)
    jax.block_until_ready(out_f32)
    assert out_f32.shape == (N, Cout, H, W), out_f32.shape
    err32 = float(jnp.max(jnp.abs(out_f32 - ref)))
    assert err32 < 1e-3, f"f32 path: max abs diff vs reference: {err32}"

    # bf16-operand MXU path (v6e/v7x recommendation): f32 accumulation.
    out_bf16 = conv_forward(x, params, use_bf16=True)
    jax.block_until_ready(out_bf16)
    assert out_bf16.shape == (N, Cout, H, W), out_bf16.shape
    err16 = float(jnp.max(jnp.abs(out_bf16 - ref)))
    assert err16 < 5e-2, f"bf16 path: max abs diff vs reference: {err16}"

    print("KERNEL_OK")
</pallas_src>

<mosaic_0001>
module attributes {stable_mosaic.version = 11 : i64} {
  func.func @conv_bn_relu_kernel(%arg0: i32, %arg1: memref<36x512xf32, #tpu.memory_space<vmem>>, %arg2: memref<8x36xf32, #tpu.memory_space<vmem>>, %arg3: memref<8x1xf32, #tpu.memory_space<vmem>>, %arg4: memref<8x1xf32, #tpu.memory_space<vmem>>, %arg5: memref<8x512xf32, #tpu.memory_space<vmem>>) attributes {dimension_semantics = [#tpu.dimension_semantics<arbitrary>], iteration_bounds = array<i64: 1>, scalar_prefetch = 0 : i64, scratch_operands = 0 : i64, tpu.core_type = #tpu.core_type<tc>, window_params = [{pipeline_mode = #tpu.pipeline_mode<synchronous>, transform_indices = @transform_0, window_bounds = array<i64: 36, 512>}, {pipeline_mode = #tpu.pipeline_mode<synchronous>, transform_indices = @transform_1, window_bounds = array<i64: 8, 36>}, {pipeline_mode = #tpu.pipeline_mode<synchronous>, transform_indices = @transform_2, window_bounds = array<i64: 8, 1>}, {pipeline_mode = #tpu.pipeline_mode<synchronous>, transform_indices = @transform_3, window_bounds = array<i64: 8, 1>}, {pipeline_mode = #tpu.pipeline_mode<synchronous>, transform_indices = @transform_4, window_bounds = array<i64: 8, 512>}]} {
    %c0 = arith.constant 0 : index
    %c0_0 = arith.constant 0 : index
    %0 = vector.load %arg2[%c0, %c0_0] : memref<8x36xf32, #tpu.memory_space<vmem>>, vector<8x36xf32>
    %c0_1 = arith.constant 0 : index
    %c0_2 = arith.constant 0 : index
    %1 = vector.load %arg1[%c0_1, %c0_2] : memref<36x512xf32, #tpu.memory_space<vmem>>, vector<36x512xf32>
    %cst = arith.constant dense<0.000000e+00> : vector<8x512xf32>
    %2 = tpu.matmul %0, %1, %cst {dimension_numbers = #tpu.dot_dimension_numbers<[1], [0], [0], [1], [0, 0, 1, 1], [], []>} : vector<8x36xf32>, vector<36x512xf32>, vector<8x512xf32> -> vector<8x512xf32>
    %cst_3 = arith.constant dense<0.000000e+00> : vector<8xf32>
    %3 = vector.multi_reduction <add>, %2, %cst_3 [1] : vector<8x512xf32> to vector<8xf32>
    %4 = vector.shape_cast %3 : vector<8xf32> to vector<8x1xf32>
    %5 = arith.mulf %2, %2 : vector<8x512xf32>
    %cst_4 = arith.constant dense<0.000000e+00> : vector<8xf32>
    %6 = vector.multi_reduction <add>, %5, %cst_4 [1] : vector<8x512xf32> to vector<8xf32>
    %7 = vector.shape_cast %6 : vector<8xf32> to vector<8x1xf32>
    %cst_5 = arith.constant 0.001953125 : f32
    %8 = vector.broadcast %cst_5 : f32 to vector<8x1xf32>
    %9 = arith.mulf %4, %8 : vector<8x1xf32>
    %cst_6 = arith.constant 0.001953125 : f32
    %10 = vector.broadcast %cst_6 : f32 to vector<8x1xf32>
    %11 = arith.mulf %7, %10 : vector<8x1xf32>
    %12 = arith.mulf %9, %9 : vector<8x1xf32>
    %13 = arith.subf %11, %12 : vector<8x1xf32>
    %cst_7 = arith.constant 0.000000e+00 : f32
    %14 = vector.broadcast %cst_7 : f32 to vector<8x1xf32>
    %15 = arith.maximumf %13, %14 : vector<8x1xf32>
    %cst_8 = arith.constant 9.99999974E-6 : f32
    %16 = vector.broadcast %cst_8 : f32 to vector<8x1xf32>
    %17 = arith.addf %15, %16 : vector<8x1xf32>
    %18 = math.rsqrt %17 : vector<8x1xf32>
    %c0_9 = arith.constant 0 : index
    %c0_10 = arith.constant 0 : index
    %19 = vector.load %arg3[%c0_9, %c0_10] : memref<8x1xf32, #tpu.memory_space<vmem>>, vector<8x1xf32>
    %20 = arith.mulf %18, %19 : vector<8x1xf32>
    %c0_11 = arith.constant 0 : index
    %c0_12 = arith.constant 0 : index
    %21 = vector.load %arg4[%c0_11, %c0_12] : memref<8x1xf32, #tpu.memory_space<vmem>>, vector<8x1xf32>
    %22 = arith.mulf %9, %20 : vector<8x1xf32>
    %23 = arith.subf %21, %22 : vector<8x1xf32>
    %24 = vector.broadcast %20 : vector<8x1xf32> to vector<8x512xf32>
    %25 = arith.mulf %2, %24 : vector<8x512xf32>
    %26 = vector.broadcast %23 : vector<8x1xf32> to vector<8x512xf32>
    %27 = arith.addf %25, %26 : vector<8x512xf32>
    %cst_13 = arith.constant 0.000000e+00 : f32
    %28 = vector.broadcast %cst_13 : f32 to vector<8x512xf32>
    %29 = arith.maximumf %27, %28 : vector<8x512xf32>
    %c0_14 = arith.constant 0 : index
    %c0_15 = arith.constant 0 : index
    %30 = vector.load %arg5[%c0_14, %c0_15] : memref<8x512xf32, #tpu.memory_space<vmem>>, vector<8x512xf32>
    tpu.vector_store %arg5[%c0_14, %c0_15], %29 {strides = array<i32>} : memref<8x512xf32, #tpu.memory_space<vmem>>, vector<8x512xf32>,
    return
  }
  func.func @transform_0(%arg0: i32) -> (i32, i32) {
    %c0_i32 = arith.constant 0 : i32
    %c0_i32_0 = arith.constant 0 : i32
    %c0_i32_1 = arith.constant 0 : i32
    return %c0_i32, %c0_i32_0 : i32, i32
  }
  func.func @transform_1(%arg0: i32) -> (i32, i32) {
    %c0_i32 = arith.constant 0 : i32
    %c0_i32_0 = arith.constant 0 : i32
    %c0_i32_1 = arith.constant 0 : i32
    return %c0_i32, %c0_i32_0 : i32, i32
  }
  func.func @transform_2(%arg0: i32) -> (i32, i32) {
    %c0_i32 = arith.constant 0 : i32
    %c0_i32_0 = arith.constant 0 : i32
    %c0_i32_1 = arith.constant 0 : i32
    return %c0_i32, %c0_i32_0 : i32, i32
  }
  func.func @transform_3(%arg0: i32) -> (i32, i32) {
    %c0_i32 = arith.constant 0 : i32
    %c0_i32_0 = arith.constant 0 : i32
    %c0_i32_1 = arith.constant 0 : i32
    return %c0_i32, %c0_i32_0 : i32, i32
  }
  func.func @transform_4(%arg0: i32) -> (i32, i32) {
    %c0_i32 = arith.constant 0 : i32
    %c0_i32_0 = arith.constant 0 : i32
    %c0_i32_1 = arith.constant 0 : i32
    return %c0_i32, %c0_i32_0 : i32, i32
  }
}

</mosaic_0001>

<bundles_post_ra>
// kernel: conv_forward.1
= control target key start
LH: loop header
LB: loop body
LE: loop exit
PB: predicated region body
PF: predicated region fallthrough
CT: control target
= control target key end

     0   :  { %v281_v3 = vmov 0.0   ;;  %vm42_vm0 = vcmask 1043456   ;;  %vm38_vm1 = vcmask 293888   ;;  %v282_v44 = vmov 0   ;;  %s389_s0 = inlined_call_operand.vmem [shape: f32[36,512], index: 0, kind: input, shape index: {}]   ;;  %s390_s1 = inlined_call_operand.vmem [shape: f32[8,36], index: 1, kind: input, shape index: {}]   ;;  %s391_s2 = inlined_call_operand.vmem [shape: f32[8,1], index: 2, kind: input, shape index: {}]   ;;  %s392_s3 = inlined_call_operand.vmem [shape: f32[8,1], index: 3, kind: input, shape index: {}]   ;;  %s393_s4 = inlined_call_operand.vmem [shape: f32[8,512], index: 4, kind: output, shape index: {}]  }
   0x1   :  { %v19_v0 = vld [vmem:[%s389_s0 + $0x8] sm:$0xff]  ;;  %v18_v2 = vld [vmem:[%s389_s0] sm:$0xff]  ;;  %119 = vmatprep.mubr.f32.mxu0 %v281_v3  ;;  %190 = vmatprep.mubr.f32.mxu1 %v281_v3  ;;  %v21_v6 = vld [vmem:[%s389_s0 + $0x18] sm:$0xff] }
   0x2   :  { %v23_v1 = vld [vmem:[%s389_s0 + $0x28] sm:$0xff]  ;;  %v22_v5 = vld [vmem:[%s389_s0 + $0x20] sm:$0xff]  ;;  %v25_v7 = vld [vmem:[%s389_s0 + $0x38] sm:$0xff]  ;;  %277 = vset.pattern.permute.xlu1 %v282_v44  ;;  %278 = vset.pattern.permute.xlu0 %v282_v44 }
   0x3   :  { %v259_v4 = vpack.c.bf16 %v23_v1, %v19_v0  ;;  %v261_v8 = vpack.c.bf16 %v22_v5, %v18_v2  ;;  %v267_v9 = vpack.c.bf16 %v25_v7, %v21_v6  ;;  %v20_v10 = vld [vmem:[%s389_s0 + $0x10] sm:$0xff]  ;;  %v27_v12 = vld [vmem:[%s389_s0 + $0x48] sm:$0xff]  ;;  %v26_v15 = vld [vmem:[%s389_s0 + $0x40] sm:$0xff] }
   0x4   :  { %v24_v11 = vld [vmem:[%s389_s0 + $0x30] sm:$0xff]  ;;  %v31_v14 = vld [vmem:[%s389_s0 + $0x68] sm:$0xff]  ;;  %v30_v16 = vld [vmem:[%s389_s0 + $0x60] sm:$0xff] }
   0x5   :  { %260 = vmatprep.subr.bf16.mxu0 %v259_v4  ;;  %v269_v13 = vpack.c.bf16 %v24_v11, %v20_v10  ;;  %268 = vmatprep.subr.bf16.mxu1 %v267_v9  ;;  %v263_v17 = vpack.c.bf16 %v31_v14, %v27_v12  ;;  %v265_v18 = vpack.c.bf16 %v30_v16, %v26_v15  ;;  %v29_v19 = vld [vmem:[%s389_s0 + $0x58] sm:$0xff]  ;;  %v28_v21 = vld [vmem:[%s389_s0 + $0x50] sm:$0xff]  ;;  %v35_v25 = vld [vmem:[%s389_s0 + $0x88] sm:$0xf] }
   0x6   :  { %262 = vmatpush1.bf16.msra.mxu0 %v261_v8  ;;  %v33_v20 = vld [vmem:[%s389_s0 + $0x78] sm:$0xff]  ;;  %v32_v23 = vld [vmem:[%s389_s0 + $0x70] sm:$0xff]  ;;  %v34_v27 = vld [vmem:[%s389_s0 + $0x80] sm:$0xf] }
   0x7   :  { %270 = vmatpush1.bf16.msra.mxu1 %v269_v13  ;;  %v271_v22 = vpack.c.bf16 %v33_v20, %v29_v19  ;;  %264 = vmatprep.subr.bf16.mxu0 %v263_v17  ;;  %v273_v24 = vpack.c.bf16 %v32_v23, %v28_v21  ;;  %v37_v26 = vld [vmem:[%s389_s0 + $0x98] sm:$0xf]  ;;  %v17_v28 = vld [vmem:[%s390_s1] sm:$0xff]  ;;  %v36_v29 = vld [vmem:[%s389_s0 + $0x90] sm:$0xf] }
   0x8   :  { %v218_v53 = vld [vmem:[%s391_s2] sm:$0xff] }
   0x9   :  { %272 = vmatprep.subr.bf16.mxu1 %v271_v22  ;;  %v220_v56 = vld [vmem:[%s392_s3] sm:$0xff] }
   0xa   :  { %266 = vmatpush1.bf16.msra.mxu0 %v265_v18 }
   0xb   :  { %274 = vmatpush1.bf16.msra.mxu1 %v273_v24  ;;  %253 = vmatprep.subr.msk.mxu0 %vm42_vm0, %v35_v25 }
   0xc   :  { %256 = vmatprep.subr.msk.mxu1 %vm42_vm0, %v37_v26 }
   0xe   :  { %254 = vmatpush1.msk.msra.mxu0 %vm42_vm0, %v34_v27 }
   0xf   :  { %255 = vmatmul.mubr.msk.f32.vlgmr.msra.gmra.mrb[0].mxu0 %vm38_vm1, %v17_v28  ;;  %257 = vmatpush1.msk.msra.mxu1 %vm42_vm0, %v36_v29 }
  0x10   :  { %258 = vmatmul.mubr.msk.f32.vlgmr.msra.gmra.mrb[0].mxu1 %vm38_vm1, %v17_v28 }
  0xe2   :  { %v121_v30 = vpop.f32.mrb[0].mxu0 }
  0xe3   :  { %v202_v31 = vmul.f32 %v121_v30, %v121_v30  ;;  %v123_v32 = vpop.f32.mrb[1].mxu0  ;;  %v192_v33 = vpop.f32.mrb[0].mxu1 }
  0xe4   :  { %v197_v34 = vadd.f32 %v123_v32, %v121_v30  ;;  %v203_v35 = vmul.f32 %v123_v32, %v123_v32  ;;  %v204_v36 = vmul.f32 %v192_v33, %v192_v33  ;;  %v194_v37 = vpop.f32.mrb[1].mxu1 }
  0xe5   :  { %v205_v40 = vmul.f32 %v194_v37, %v194_v37 }
  0xe6   :  { %v206_v38 = vadd.f32 %v203_v35, %v202_v31  ;;  %v198_v39 = vadd.f32 %v197_v34, %v192_v33 }
  0xe8   :  { %v199_v41 = vadd.f32 %v198_v39, %v194_v37  ;;  %v207_v42 = vadd.f32 %v206_v38, %v204_v36 }
  0xea   :  { %200 = vadd.xlane.f32.xlu0 %v199_v41  ;;  %v208_v43 = vadd.f32 %v207_v42, %v205_v40 }
  0xee   :  { %209 = vadd.xlane.f32.xlu0 %v208_v43 }
 0x177   :  { %v201_v45 = vpop.xlane.xlu0 %200 }
 0x178   :  { %v211_v46 = vmul.f32 0.001953125, %v201_v45 }
 0x17a   :  { %v213_v48 = vmul.f32 %v211_v46, %v211_v46 }
 0x17b   :  { %v210_v47 = vpop.xlane.xlu0 %209 }
 0x17c   :  { %v212_v49 = vmul.f32 0.001953125, %v210_v47 }
 0x17e   :  { %v214_v50 = vsub.f32 %v212_v49, %v213_v48 }
 0x180   :  { %v215_v51 = vmax.f32 %v214_v50, 0.0 }
 0x182   :  { %v216_v52 = vadd.f32 1e-05, %v215_v51 }
 0x184   :  { %279 = vrsqrt.f32 %v216_v52 }
 0x18e   :  { %v280_v54 = vpop.eup %279 }
 0x18f   :  { %v219_v55 = vmul.f32 %v280_v54, %v218_v53 }
 0x191   :  { %225 = vperm.xlu1 %277, %v219_v55   ;;  %v221_v57 = vmul.f32 %v219_v55, %v211_v46 }
 0x193   :  { %v222_v58 = vsub.f32 %v220_v56, %v221_v57 }
 0x195   :  { %234 = vperm.xlu1 %277, %v222_v58  }
 0x210   :  { %v226_v59 = vpop.permute.xlu1 %225 }
 0x211   :  { %v228_v60 = vmul.f32 %v226_v59, %v121_v30  ;;  %v229_v61 = vmul.f32 %v226_v59, %v123_v32  ;;  %v230_v62 = vmul.f32 %v226_v59, %v192_v33  ;;  %v231_v63 = vmul.f32 %v226_v59, %v194_v37 }
 0x214   :  { %v235_v0 = vpop.permute.xlu1 %234 }
 0x215   :  { %v237_v1 = vadd.f32 %v235_v0, %v228_v60  ;;  %v238_v2 = vadd.f32 %v235_v0, %v229_v61  ;;  %v239_v3 = vadd.f32 %v235_v0, %v230_v62  ;;  %v240_v4 = vadd.f32 %v235_v0, %v231_v63 }
 0x217   :  { %v241_v5 = vmax.f32 %v237_v1, 0.0  ;;  %v242_v6 = vmax.f32 %v238_v2, 0.0  ;;  %v243_v7 = vmax.f32 %v239_v3, 0.0  ;;  %v244_v8 = vmax.f32 %v240_v4, 0.0 }
 0x219   :  { %245 = vst [vmem:[%s393_s4] sm:$0xff] %v241_v5  ;;  %246 = vst [vmem:[%s393_s4 + $0x8] sm:$0xff] %v242_v6 }
 0x21a   :  { %247 = vst [vmem:[%s393_s4 + $0x10] sm:$0xff] %v243_v7  ;;  %248 = vst [vmem:[%s393_s4 + $0x18] sm:$0xff] %v244_v8 }

</bundles_post_ra>
